<compile_context>
chip_gen: v6e
topology: v6e:2x2x1
jax: 0.10.0
libtpu: 0.0.40
codegen_flags: <defaults>
</compile_context>

<pallas_src>
import jax
import jax.numpy as jnp
from jax.experimental import pallas as pl
from jax.experimental.pallas import tpu as pltpu

IN_FEATURES = 20
HIDDEN = 256
OUT_FEATURES = 10
OUT_PAD = 128        # lane-dense padded output width (multiple of 128 lanes)

MAX_TB = 4096        # big tiles amortize the ~0.35us per-step pipeline cost
MIN_TB = 1024        # but never shrink tiles below this when splitting the grid
MIN_GRID_STEPS = 4   # keep >=2 (ideally 4+) steps so v7x's 2 TCs both stream
SMALL_BATCH = 1024   # <= this: single grid-less invocation (latency fast path)
SUBLANE = 16         # batch alignment: 16 = bf16 sublane packing (ok for f32)


def _round_up(v, m):
    return ((v + m - 1) // m) * m


def mlp_kernel(x_ref, w1_ref, b1_ref, w2_ref, b2_ref, o_ref):
    # hidden = relu(x @ W1 + b1): MXU matmul (bf16 operands by default) with
    # f32 accumulation; bias + ReLU epilogue on the VPU in f32.
    h = jnp.dot(x_ref[...], w1_ref[...], preferred_element_type=jnp.float32)
    h = jnp.maximum(h + b1_ref[...], 0.0)
    # out = h @ W2p + b2p: W2p/b2p are zero-padded to 128 lanes so the final
    # store is a full-width unmasked vst instead of a masked 10-wide store.
    o = jnp.dot(h.astype(w2_ref.dtype), w2_ref[...],
                preferred_element_type=jnp.float32)
    o_ref[...] = (o + b2_ref[...]).astype(o_ref.dtype)


def mlp_forward(x, w1, b1, w2, b2, *, compute_dtype=jnp.bfloat16, out_dtype=None):
    """x: (B, 20); w1: (20, 256); b1: (1, 256); w2: (256, 10); b2: (1, 10)."""
    B = x.shape[0]
    out_dtype = x.dtype if out_dtype is None else out_dtype

    # --- layout plumbing (outside the kernel) ------------------------------
    # 1) Lane-dense output: zero-pad the N=10 projection to 128 columns.
    #    Constant-folded under jit; the extra columns are exact zeros and are
    #    sliced off below, so numerics are unchanged.
    w2p = jnp.pad(w2, ((0, 0), (0, OUT_PAD - OUT_FEATURES)))
    b2p = jnp.pad(b2, ((0, 0), (0, OUT_PAD - OUT_FEATURES)))

    # 2) bf16 MXU operands (HBM-bound kernel: halves the streamed-x read and
    #    doubles MXU rate). Biases / accumulation / epilogue stay f32.
    xc = x.astype(compute_dtype)
    w1c = w1.astype(compute_dtype)
    w2c = w2p.astype(compute_dtype)
    b1c = b1.astype(jnp.float32)
    b2c = b2p.astype(jnp.float32)

    # 3) Batch tiling: big tiles to amortize per-step overhead, but for large B
    #    keep MIN_GRID_STEPS steps so the "parallel" axis shards across both
    #    v7x TensorCores instead of collapsing to a single-step grid.
    if B <= SMALL_BATCH:
        tb = _round_up(B, SUBLANE)
    else:
        tb = min(MAX_TB,
                 max(MIN_TB, _round_up(pl.cdiv(B, MIN_GRID_STEPS), SUBLANE)))
    b_pad = _round_up(B, tb)
    xp = jnp.pad(xc, ((0, b_pad - B), (0, 0))) if b_pad != B else xc
    n_steps = b_pad // tb

    # Advisory cost estimate reflecting *real* HBM traffic: x is stored
    # lane-padded to 128 in the default tiled layout, and the output is the
    # padded 128-wide slab.
    flops = 2 * b_pad * (IN_FEATURES * HIDDEN + HIDDEN * OUT_PAD)
    bytes_accessed = (
        b_pad * 128 * jnp.dtype(compute_dtype).itemsize            # streamed x
        + b_pad * OUT_PAD * jnp.dtype(out_dtype).itemsize          # streamed out
        + (w1c.size + w2c.size) * jnp.dtype(compute_dtype).itemsize
        + (b1c.size + b2c.size) * 4)                               # resident biases
    cost = pl.CostEstimate(flops=flops, transcendentals=0,
                           bytes_accessed=bytes_accessed)

    if n_steps == 1:
        # Small-batch fast path: single invocation, full arrays as VMEM blocks,
        # no grid / pipeline / megacore machinery.
        out = pl.pallas_call(
            mlp_kernel,
            out_shape=jax.ShapeDtypeStruct((b_pad, OUT_PAD), out_dtype),
            cost_estimate=cost,
        )(xp, w1c, b1c, w2c, b2c)
    else:
        out = pl.pallas_call(
            mlp_kernel,
            out_shape=jax.ShapeDtypeStruct((b_pad, OUT_PAD), out_dtype),
            grid=(n_steps,),
            in_specs=[
                pl.BlockSpec((tb, IN_FEATURES), lambda i: (i, 0)),      # streamed x
                pl.BlockSpec((IN_FEATURES, HIDDEN), lambda i: (0, 0)),  # resident W1
                pl.BlockSpec((1, HIDDEN), lambda i: (0, 0)),            # resident b1
                pl.BlockSpec((HIDDEN, OUT_PAD), lambda i: (0, 0)),      # resident W2p
                pl.BlockSpec((1, OUT_PAD), lambda i: (0, 0)),           # resident b2p
            ],
            out_specs=pl.BlockSpec((tb, OUT_PAD), lambda i: (i, 0)),    # streamed out
            compiler_params=pltpu.CompilerParams(
                dimension_semantics=("parallel",)),                     # v7x: 2 TCs
            cost_estimate=cost,
        )(xp, w1c, b1c, w2c, b2c)

    # Undo batch padding and the lane padding of the output projection.
    return out[:B, :OUT_FEATURES]


def init_params(key):
    """Deterministic init mirroring nn.Linear's U(-1/sqrt(fan_in), 1/sqrt(fan_in))."""
    k1, k2, k3, k4 = jax.random.split(key, 4)
    in1, h, out = IN_FEATURES, HIDDEN, OUT_FEATURES
    bound1 = 1.0 / jnp.sqrt(in1)
    bound2 = 1.0 / jnp.sqrt(h)
    # Stored transposed relative to PyTorch's (out, in) so the kernel does x @ W.
    w1 = jax.random.uniform(k1, (in1, h), jnp.float32, -bound1, bound1)
    b1 = jax.random.uniform(k2, (1, h), jnp.float32, -bound1, bound1)
    w2 = jax.random.uniform(k3, (h, out), jnp.float32, -bound2, bound2)
    b2 = jax.random.uniform(k4, (1, out), jnp.float32, -bound2, bound2)
    return w1, b1, w2, b2


if __name__ == "__main__":
    key = jax.random.PRNGKey(0)
    kx, kp = jax.random.split(key)

    # forward() implies input of shape (batch, 20); use batch=2 like the script.
    x = jax.random.uniform(kx, (2, IN_FEATURES), jnp.float32)
    w1, b1, w2, b2 = init_params(kp)

    def ref_fn(xv):  # pure-JAX f32 reference of the same math
        return jnp.maximum(xv @ w1 + b1, 0.0) @ w2 + b2

    # 1) f32 compute path: matches the PyTorch-module numerics tightly.
    out_f32 = jax.block_until_ready(
        mlp_forward(x, w1, b1, w2, b2, compute_dtype=jnp.float32))
    assert out_f32.shape == (2, OUT_FEATURES)
    assert jnp.allclose(out_f32, ref_fn(x), atol=1e-5, rtol=1e-5)

    # 2) Default bf16-operand fast path (f32 accumulation): loosened tolerance.
    out_bf16 = jax.block_until_ready(mlp_forward(x, w1, b1, w2, b2))
    assert out_bf16.shape == (2, OUT_FEATURES)
    assert jnp.allclose(out_bf16, ref_fn(x), atol=5e-2, rtol=5e-2)

    # 3) Non-multiple large batch exercising the multi-step "parallel" grid
    #    (tile splitting, batch padding, streamed pipeline).
    xb = jax.random.uniform(kx, (4100, IN_FEATURES), jnp.float32)
    out_big = jax.block_until_ready(mlp_forward(xb, w1, b1, w2, b2))
    assert out_big.shape == (4100, OUT_FEATURES)
    assert jnp.allclose(out_big, ref_fn(xb), atol=5e-2, rtol=5e-2)

    print("KERNEL_OK")
</pallas_src>

<mosaic_0001>
module attributes {stable_mosaic.version = 11 : i64} {
  func.func @mlp_kernel(%arg0: memref<16x20xf32, #tpu.memory_space<vmem>>, %arg1: memref<20x256xf32, #tpu.memory_space<vmem>>, %arg2: memref<1x256xf32, #tpu.memory_space<vmem>>, %arg3: memref<256x128xf32, #tpu.memory_space<vmem>>, %arg4: memref<1x128xf32, #tpu.memory_space<vmem>>, %arg5: memref<16x128xf32, #tpu.memory_space<vmem>>) attributes {dimension_semantics = [], scalar_prefetch = 0 : i64, scratch_operands = 0 : i64, tpu.core_type = #tpu.core_type<tc>} {
    %c0 = arith.constant 0 : index
    %c0_0 = arith.constant 0 : index
    %0 = vector.load %arg0[%c0, %c0_0] : memref<16x20xf32, #tpu.memory_space<vmem>>, vector<16x20xf32>
    %c0_1 = arith.constant 0 : index
    %c0_2 = arith.constant 0 : index
    %1 = vector.load %arg1[%c0_1, %c0_2] : memref<20x256xf32, #tpu.memory_space<vmem>>, vector<20x256xf32>
    %cst = arith.constant dense<0.000000e+00> : vector<16x256xf32>
    %2 = tpu.matmul %0, %1, %cst {dimension_numbers = #tpu.dot_dimension_numbers<[1], [0], [0], [1], [0, 0, 1, 1], [], []>} : vector<16x20xf32>, vector<20x256xf32>, vector<16x256xf32> -> vector<16x256xf32>
    %c0_3 = arith.constant 0 : index
    %c0_4 = arith.constant 0 : index
    %3 = vector.load %arg2[%c0_3, %c0_4] : memref<1x256xf32, #tpu.memory_space<vmem>>, vector<1x256xf32>
    %4 = vector.broadcast %3 : vector<1x256xf32> to vector<16x256xf32>
    %5 = arith.addf %2, %4 : vector<16x256xf32>
    %cst_5 = arith.constant 0.000000e+00 : f32
    %6 = vector.broadcast %cst_5 : f32 to vector<16x256xf32>
    %7 = arith.maximumf %5, %6 : vector<16x256xf32>
    %c0_6 = arith.constant 0 : index
    %c0_7 = arith.constant 0 : index
    %8 = vector.load %arg3[%c0_6, %c0_7] : memref<256x128xf32, #tpu.memory_space<vmem>>, vector<256x128xf32>
    %cst_8 = arith.constant dense<0.000000e+00> : vector<16x128xf32>
    %9 = tpu.matmul %7, %8, %cst_8 {dimension_numbers = #tpu.dot_dimension_numbers<[1], [0], [0], [1], [0, 0, 1, 1], [], []>} : vector<16x256xf32>, vector<256x128xf32>, vector<16x128xf32> -> vector<16x128xf32>
    %c0_9 = arith.constant 0 : index
    %c0_10 = arith.constant 0 : index
    %10 = vector.load %arg4[%c0_9, %c0_10] : memref<1x128xf32, #tpu.memory_space<vmem>>, vector<1x128xf32>
    %11 = vector.broadcast %10 : vector<1x128xf32> to vector<16x128xf32>
    %12 = arith.addf %9, %11 : vector<16x128xf32>
    %c0_11 = arith.constant 0 : index
    %c0_12 = arith.constant 0 : index
    %13 = vector.load %arg5[%c0_11, %c0_12] : memref<16x128xf32, #tpu.memory_space<vmem>>, vector<16x128xf32>
    tpu.vector_store %arg5[%c0_11, %c0_12], %12 {strides = array<i32>} : memref<16x128xf32, #tpu.memory_space<vmem>>, vector<16x128xf32>,
    return
  }
}

</mosaic_0001>

<bundles_post_ra>
// kernel: tpu_custom_call.1
= control target key start
LH: loop header
LB: loop body
LE: loop exit
PB: predicated region body
PF: predicated region fallthrough
CT: control target
= control target key end

     0   :  { %10 = vsyncpa [#allocation3], 0  ;;  %s517_s0 = inlined_call_operand.hbm [shape: f32[16,20], index: 0, kind: input, shape index: {}]   ;;  %s518_s1 = inlined_call_operand.hbm [shape: f32[20,256], index: 1, kind: input, shape index: {}]   ;;  %s519_s2 = inlined_call_operand.vmem [shape: f32[1,256], index: 2, kind: input, shape index: {}]   ;;  %s520_s3 = inlined_call_operand.hbm [shape: f32[256,128], index: 3, kind: input, shape index: {}]   ;;  %s521_s4 = inlined_call_operand.vmem [shape: f32[1,128], index: 4, kind: input, shape index: {}]   ;;  %s522_s5 = inlined_call_operand.hbm [shape: f32[16,128], index: 5, kind: output, shape index: {}]  }
   0x1   :  { %11 = vsyncpa [#allocation6], 0 }
   0x2   :  { %12 = vsyncpa [#allocation4], 0  ;;  %s449_s18 = smov [#allocation5]  }
   0x3   :  { %s30_s19 = sshll.u32 %s449_s18, 4  ;;  %s31_s19 = int_to_ptr.vmem [resolvable:$true] %s30_s19 }
   0x4   :  { %s371_s20 = scalar_lea.vmem %s31_s19, 768  ;;  %p376_p1 = scmp.lt.s32.totalorder %s31_s19, %s31_s19 }
   0x5   :  { %p372_p0 = scmp.ne.s32.totalorder %s31_s19, %s371_s20  ;;  %p377_p2 = scmp.lt.s32.totalorder %s371_s20, %s371_s20 }
   0x7   :  { %p378_p3 = por %p377_p2, %p376_p1 }
   0x9   :  { %p379_p4 = pnand %p378_p3, %p372_p0 }
   0xb   :  { %382 = shalt.err (!%p379_p4)
}
   0xc   :  { %s450_s21 = smov 256   ;;  %s451_s22 = smov 16  }
   0xd   :  { %36 = dma.hbm_to_vmem [thread:$0]  %s518_s1, 768, %s31_s19, [#allocation6], %s450_s21, %s450_s21, %s451_s22  }
   0xe   :  { %s452_s25 = smov [#allocation2]  }
   0xf   :  { %s18_s26 = sshll.u32 %s452_s25, 4  ;;  %s19_s26 = int_to_ptr.vmem [resolvable:$true] %s18_s26 }
  0x10   :  { %s391_s27 = scalar_lea.vmem %s19_s26, 256  ;;  %p396_p6 = scmp.lt.s32.totalorder %s19_s26, %s19_s26 }
  0x11   :  { %p392_p5 = scmp.ne.s32.totalorder %s19_s26, %s391_s27  ;;  %p397_p7 = scmp.lt.s32.totalorder %s391_s27, %s391_s27 }
  0x13   :  { %p398_p8 = por %p397_p7, %p396_p6 }
  0x15   :  { %p399_p9 = pnand %p398_p8, %p392_p5 }
  0x17   :  { %402 = shalt.err (!%p399_p9)
}
  0x18   :  { %s453_s28 = smov 128   ;;  %s454_s29 = smov 8  }
  0x19   :  { %24 = dma.hbm_to_vmem [thread:$0]  %s517_s0, 256, %s19_s26, [#allocation3], %s453_s28, %s453_s28, %s454_s29  }
  0x1a   :  { %s455_s1 = smov [#allocation7]  }
  0x1b   :  { %s44_s7 = sshll.u32 %s455_s1, 4  ;;  %s45_s7 = int_to_ptr.vmem [resolvable:$true] %s44_s7 }
  0x1c   :  { %s411_s8 = scalar_lea.vmem %s45_s7, 4096  ;;  %p416_p11 = scmp.lt.s32.totalorder %s45_s7, %s45_s7 }
  0x1d   :  { %p412_p10 = scmp.ne.s32.totalorder %s45_s7, %s411_s8  ;;  %p417_p12 = scmp.lt.s32.totalorder %s411_s8, %s411_s8 }
  0x1f   :  { %p418_p13 = por %p417_p12, %p416_p11 }
  0x21   :  { %p419_p0 = pnand %p418_p13, %p412_p10 }
  0x23   :  { %422 = shalt.err (!%p419_p0)
}
  0x24   :  { %50 = dma.hbm_to_vmem [thread:$0]  %s520_s3, 4096, %s45_s7, [#allocation6], %s453_s28, %s453_s28, %s454_s29  }
  0x25   :  { %443 = dma.done.wait [#allocation3], 256  }
  0x26   :  { %444 = vsyncadd [#allocation3], 4294967040 }
  0x27   :  { %445 = dma.done.wait [#allocation6], 4864  }
  0x28   :  { %446 = vsyncadd [#allocation6], 4294962432  ;;  %v456_v0 = vmov 0.0   ;;  %vm89_vm0 = vcmask 1043456   ;;  %v69_v1 = vld [vmem:[#allocation5 + $0x28] sm:$0xf]  ;;  %v72_v41 = vlaneseq }
  0x29   :  { %160 = vmatprep.mubr.f32.mxu0 %v456_v0  ;;  %v68_v2 = vld [vmem:[#allocation5 + $0x20] sm:$0xf]  ;;  %v67_v3 = vld [vmem:[#allocation5 + $0x18] sm:$0xff]  ;;  %311 = vmatprep.subr.msk.mxu0 %vm89_vm0, %v69_v1  ;;  %v66_v4 = vld [vmem:[#allocation5 + $0x10] sm:$0xff]  ;;  %vm82_vm1 = vcmask 162816   ;;  %s457_s12 = smov [#allocation8]  }
  0x2a   :  { %312 = vmatpush1.msk.msra.mxu0 %vm89_vm0, %v68_v2  ;;  %v65_v5 = vld [vmem:[#allocation5 + $0x8] sm:$0xff]  ;;  %v64_v6 = vld [vmem:[#allocation5] sm:$0xff]  ;;  %v62_v11 = vld [vmem:[#allocation2] sm:$0xff]  ;;  %v73_v42 = vshrl.u32 %v72_v41, 7  ;;  %s298_s13 = sshll.u32 %s457_s12, 4  ;;  %s299_s13 = int_to_ptr.vmem [resolvable:$true] %s298_s13 }
  0x2b   :  { %v208_v7 = vld [vmem:[#allocation7 + $0xf8] sm:$0xff]  ;;  %124 = vmatprep.subr.mxu0 %v67_v3  ;;  %v207_v9 = vld [vmem:[#allocation7 + $0xf0] sm:$0xff]  ;;  %v206_v12 = vld [vmem:[#allocation7 + $0xe8] sm:$0xff]  ;;  %s423_s14 = scalar_lea.vmem %s299_s13, 256  ;;  %p428_p2 = scmp.lt.s32.totalorder %s299_s13, %s299_s13 }
  0x2c   :  { %316 = vmatprep.subr.mxu1 %v208_v7  ;;  %v192_v8 = vld [vmem:[#allocation7 + $0x78] sm:$0xff]  ;;  %v191_v10 = vld [vmem:[#allocation7 + $0x70] sm:$0xff]  ;;  %125 = vmatpush1.msra.mxu0 %v66_v4  ;;  %v190_v13 = vld [vmem:[#allocation7 + $0x68] sm:$0xff]  ;;  %v74_v43 = vsub.s32 0, %v73_v42  ;;  %v78_v45 = vsub.s32 1, %v73_v42  ;;  %p424_p1 = scmp.ne.s32.totalorder %s299_s13, %s423_s14  ;;  %p429_p3 = scmp.lt.s32.totalorder %s423_s14, %s423_s14 }
  0x2d   :  { %317 = vmatpush3.msra.mxu1 %v192_v8  ;;  %126 = vmatprep.subr.mxu0 %v65_v5  ;;  %v205_v14 = vld [vmem:[#allocation7 + $0xe0] sm:$0xff]  ;;  %v63_v16 = vld [vmem:[#allocation2 + $0x8] sm:$0xff]  ;;  %v204_v17 = vld [vmem:[#allocation7 + $0xd8] sm:$0xff] }
  0x2e   :  { %318 = vmatprep.subr.mxu1 %v207_v9  ;;  %127 = vmatpush1.msra.mxu0 %v64_v6  ;;  %v189_v15 = vld [vmem:[#allocation7 + $0x60] sm:$0xff]  ;;  %v188_v18 = vld [vmem:[#allocation7 + $0x58] sm:$0xff]  ;;  %v203_v19 = vld [vmem:[#allocation7 + $0xd0] sm:$0xff]  ;;  %p430_p4 = por %p429_p3, %p428_p2 }
  0x2f   :  { %319 = vmatpush3.msra.mxu1 %v191_v10  ;;  %313 = vmatmul.mubr.msk.f32.vlgmr.msra.gmra.mxu0 %vm82_vm1, %v62_v11  ;;  %v187_v20 = vld [vmem:[#allocation7 + $0x50] sm:$0xff]  ;;  %v202_v21 = vld [vmem:[#allocation7 + $0xc8] sm:$0xff]  ;;  %v201_v23 = vld [vmem:[#allocation7 + $0xc0] sm:$0xff] }
  0x30   :  { %320 = vmatprep.subr.mxu1 %v206_v12  ;;  %166 = vmatprep.mubr.f32.mxu0 %v456_v0  ;;  %v186_v22 = vld [vmem:[#allocation7 + $0x48] sm:$0xff]  ;;  %v185_v24 = vld [vmem:[#allocation7 + $0x40] sm:$0xff]  ;;  %v200_v25 = vld [vmem:[#allocation7 + $0xb8] sm:$0xff]  ;;  %p431_p5 = pnand %p430_p4, %p424_p1 }
  0x31   :  { %321 = vmatpush3.msra.mxu1 %v190_v13  ;;  %v184_v26 = vld [vmem:[#allocation7 + $0x38] sm:$0xff]  ;;  %v199_v27 = vld [vmem:[#allocation7 + $0xb0] sm:$0xff]  ;;  %v198_v29 = vld [vmem:[#allocation7 + $0xa8] sm:$0xff] }
  0x32   :  { %322 = vmatprep.subr.mxu1 %v205_v14  ;;  %v183_v28 = vld [vmem:[#allocation7 + $0x30] sm:$0xff]  ;;  %v182_v30 = vld [vmem:[#allocation7 + $0x28] sm:$0xff]  ;;  %v197_v31 = vld [vmem:[#allocation7 + $0xa0] sm:$0xff] }
  0x33   :  { %323 = vmatpush3.msra.mxu1 %v189_v15  ;;  %314 = vmatmul.mubr.msk.f32.gmra.mxu0 %vm82_vm1, %v63_v16  ;;  %v181_v32 = vld [vmem:[#allocation7 + $0x20] sm:$0xff]  ;;  %v196_v33 = vld [vmem:[#allocation7 + $0x98] sm:$0xff]  ;;  %v195_v35 = vld [vmem:[#allocation7 + $0x90] sm:$0xff] }
  0x34   :  { %324 = vmatprep.subr.mxu1 %v204_v17  ;;  %v180_v34 = vld [vmem:[#allocation7 + $0x18] sm:$0xff]  ;;  %v179_v36 = vld [vmem:[#allocation7 + $0x10] sm:$0xff]  ;;  %v194_v37 = vld [vmem:[#allocation7 + $0x88] sm:$0xff] }
  0x35   :  { %325 = vmatpush3.msra.mxu1 %v188_v18  ;;  %v178_v38 = vld [vmem:[#allocation7 + $0x8] sm:$0xff]  ;;  %v193_v39 = vld [vmem:[#allocation7 + $0x80] sm:$0xff] }
  0x36   :  { %326 = vmatprep.subr.mxu1 %v203_v19  ;;  %v177_v40 = vld [vmem:[#allocation7] sm:$0xff] }
  0x37   :  { %327 = vmatpush3.msra.mxu1 %v187_v20  ;;  %v70_v44 = vld [vmem:[%s519_s2] sm:$0x3] }
  0x38   :  { %328 = vmatprep.subr.mxu1 %v202_v21  ;;  %v75_v46 = vrot.slane %v70_v44, %v74_v43  ;;  %v79_v47 = vrot.slane %v70_v44, %v78_v45  ;;  %v315_v61 = vld [vmem:[%s521_s4] ss:$0 sm:$0xff] }
  0x39   :  { %329 = vmatpush3.msra.mxu1 %v186_v22 }
  0x3a   :  { %330 = vmatprep.subr.mxu1 %v201_v23 }
  0x3b   :  { %331 = vmatpush3.msra.mxu1 %v185_v24 }
  0x3c   :  { %332 = vmatprep.subr.mxu1 %v200_v25 }
  0x3d   :  { %333 = vmatpush3.msra.mxu1 %v184_v26 }
  0x3e   :  { %334 = vmatprep.subr.mxu1 %v199_v27 }
  0x3f   :  { %335 = vmatpush3.msra.mxu1 %v183_v28 }
  0x40   :  { %336 = vmatprep.subr.mxu1 %v198_v29 }
  0x41   :  { %337 = vmatpush3.msra.mxu1 %v182_v30 }
  0x42   :  { %338 = vmatprep.subr.mxu1 %v197_v31 }
  0x43   :  { %339 = vmatpush3.msra.mxu1 %v181_v32 }
  0x44   :  { %340 = vmatprep.subr.mxu1 %v196_v33 }
  0x45   :  { %341 = vmatpush3.msra.mxu1 %v180_v34 }
  0x46   :  { %342 = vmatprep.subr.mxu1 %v195_v35 }
  0x47   :  { %343 = vmatpush3.msra.mxu1 %v179_v36 }
  0x48   :  { %344 = vmatprep.subr.mxu1 %v194_v37 }
  0x49   :  { %345 = vmatpush3.msra.mxu1 %v178_v38 }
  0x4a   :  { %346 = vmatprep.subr.mxu1 %v193_v39 }
  0x4b   :  { %347 = vmatpush3.msra.mxu1 %v177_v40 }
  0xef   :  { %v162_v48 = vpop.f32.mrf.mxu0 }
  0xf0   :  { %v163_v49 = vadd.f32 %v162_v48, %v75_v46 }
  0xf1   :  { %v164_v50 = vpop.f32.mrf.mxu0 }
  0xf2   :  { %v165_v51 = vadd.f32 %v164_v50, %v79_v47  ;;  %v173_v54 = vmax.f32 %v163_v49, 0.0 }
  0xf3   :  { %v168_v52 = vpop.f32.mrf.mxu0 }
  0xf4   :  { %v174_v53 = vmax.f32 %v165_v51, 0.0  ;;  %v169_v55 = vadd.f32 %v168_v52, %v75_v46 }
  0xf5   :  { %v170_v56 = vpop.f32.mrf.mxu0 }
  0xf6   :  { %v171_v57 = vadd.f32 %v170_v56, %v79_v47  ;;  %280 = vmatprep.mubr.f32.mxu1 %v174_v53  ;;  %v175_v59 = vmax.f32 %v169_v55, 0.0 }
  0xf7   :  { %281 = vmatmul.mubr.f32.vlgmr.msra.gmra.mxu1 %v173_v54 }
  0xf8   :  { %v176_v58 = vmax.f32 %v171_v57, 0.0 }
  0xfa   :  { %285 = vmatprep.mubr.f32.mxu1 %v176_v58 }
  0xfb   :  { %286 = vmatmul.mubr.f32.gmra.mxu1 %v175_v59 }
 0x1b7   :  { %v348_v60 = vpop.f32.mrf.mxu1 }
 0x1b9   :  { %v349_v62 = vpop.f32.mrf.mxu1 }
 0x1ba   :  { %v350_v63 = vadd.f32 %v349_v62, %v348_v60 }
 0x1bb   :  { %v351_v0 = vpop.f32.mrf.mxu1 }
 0x1bc   :  { %v283_v1 = vadd.f32 %v350_v63, %v315_v61 }
 0x1bd   :  { %v352_v2 = vpop.f32.mrf.mxu1 }
 0x1be   :  { %291 = vst [vmem:[#allocation8] sm:$0xff] %v283_v1  ;;  %v353_v3 = vadd.f32 %v352_v2, %v351_v0 }
 0x1c0   :  { %v288_v4 = vadd.f32 %v353_v3, %v315_v61 }
 0x1c2   :  { %292 = vst [vmem:[#allocation8 + $0x8] sm:$0xff] %v288_v4 }
 0x1c3   :  { %434 = shalt.err (!%p431_p5)
}
 0x1c4   :  { %304 = dma.vmem_to_hbm [thread:$0]  %s299_s13, 256, %s522_s5, [#allocation4], %s453_s28, %s453_s28, %s454_s29  }
 0x1c5   :  { %447 = dma.done.wait [#allocation4], 256  }
 0x1c6   :  { %448 = vsyncadd [#allocation4], 4294967040 }
 0x1c7   :  { %308 = vsyncpa [#allocation3], 1 }
 0x1c8   :  { %309 = vsyncpa [#allocation6], 1 }
 0x1c9   :  { %310 = vsyncpa [#allocation4], 1 }

</bundles_post_ra>
